<compile_context>
chip_gen: v7x
topology: tpu7x:2x2x1
jax: 0.10.0
libtpu: 0.0.40
codegen_flags: <defaults>
</compile_context>

<pallas_src>
import functools

import jax
import jax.numpy as jnp
from jax import lax
from jax.experimental import pallas as pl
from jax.experimental.pallas import tpu as pltpu

EPS = 1e-8


def _round_up(n, m):
    return (n + m - 1) // m * m


def _sim_kernel(x_ref, y_ref, o_ref, *, inv_temp):
    x = x_ref[...]                                   # (TB, D)
    y = y_ref[...]                                   # (TN, D)
    xf = x.astype(jnp.float32)
    yf = y.astype(jnp.float32)

    # Per-row L2 norms (small cross-lane reduce), clamped; 1/temp folded into
    # the x-side scale so the matmul output is final.
    # TODO(synk): eps is applied per-norm (max(nx,eps)*max(ny,eps)) instead of
    # max(nx*ny, eps); identical except for near-zero vectors.
    inv_nx = inv_temp / jnp.maximum(
        jnp.sqrt(jnp.sum(xf * xf, axis=-1, keepdims=True)), EPS)   # (TB, 1)
    inv_ny = 1.0 / jnp.maximum(
        jnp.sqrt(jnp.sum(yf * yf, axis=-1, keepdims=True)), EPS)   # (TN, 1)

    # Pre-scale, then cast back so bf16 inputs hit the MXU at native precision.
    xs = (xf * inv_nx).astype(x.dtype)
    ys = (yf * inv_ny).astype(y.dtype)

    # Contract the last dims directly on the MXU (no explicit y.T).
    out = lax.dot_general(
        xs, ys,
        dimension_numbers=(((1,), (1,)), ((), ())),
        preferred_element_type=jnp.float32,
    )                                                # (TB, TN)
    o_ref[...] = out.astype(o_ref.dtype)


def similarity(x, y, temp, *, tb_max=256, tn_max=512):
    """Pairwise cosine similarity divided by temp.

    Accepts x of shape (B, 1, D) or (B, D) and y of shape (1, N, D) or (N, D);
    returns (B, N) float32, matching CosineSimilarity(dim=-1)(x, y) / temp
    under broadcasting.
    """
    if x.ndim == 3 and x.shape[1] == 1:
        x2 = x[:, 0, :]
    else:
        x2 = x.reshape(-1, x.shape[-1])
    if y.ndim == 3 and y.shape[0] == 1:
        y2 = y[0]
    else:
        y2 = y.reshape(-1, y.shape[-1])

    B, D = x2.shape
    N, Dy = y2.shape
    assert D == Dy, "feature dims must match"

    # Lane/sublane-friendly padded sizes and tile shapes.
    pD = _round_up(D, 128)
    TB = min(tb_max, _round_up(B, 8))      # sublane multiple
    TN = min(tn_max, _round_up(N, 128))    # lane-dense output tiles
    pB = _round_up(B, TB)
    pN = _round_up(N, TN)

    xp = x2 if (pB == B and pD == D) else jnp.pad(x2, ((0, pB - B), (0, pD - D)))
    yp = y2 if (pN == N and pD == D) else jnp.pad(y2, ((0, pN - N), (0, pD - D)))

    grid = (pB // TB, pN // TN)

    # TODO(synk): for very large D where (TB,pD)+(TN,pD) tiles no longer fit
    # VMEM, add a third "arbitrary" reduction grid axis over D with f32
    # accumulators for the dot products and the squared norms.
    out = pl.pallas_call(
        functools.partial(_sim_kernel, inv_temp=float(1.0 / temp)),
        out_shape=jax.ShapeDtypeStruct((pB, pN), jnp.float32),
        grid_spec=pltpu.PrefetchScalarGridSpec(
            num_scalar_prefetch=0,
            grid=grid,
            in_specs=[
                pl.BlockSpec((TB, pD), lambda i, j: (i, 0)),
                pl.BlockSpec((TN, pD), lambda i, j: (j, 0)),
            ],
            out_specs=pl.BlockSpec((TB, TN), lambda i, j: (i, j)),
        ),
        compiler_params=pltpu.CompilerParams(
            dimension_semantics=("parallel", "parallel")),
    )(xp, yp)

    return out[:B, :N]


def _reference(x, y, temp):
    # Pure-JAX reference reproducing torch.nn.CosineSimilarity(dim=-1) / temp.
    num = jnp.sum(x * y, axis=-1)
    nx = jnp.sqrt(jnp.sum(x * x, axis=-1))
    ny = jnp.sqrt(jnp.sum(y * y, axis=-1))
    return num / jnp.maximum(nx * ny, EPS) / temp


if __name__ == "__main__":
    temp = 0.05
    key = jax.random.PRNGKey(0)

    # Case 1: the original small contrastive layout.
    B, N, D = 8, 8, 32
    kx, ky, key = jax.random.split(key, 3)
    x = jax.random.normal(kx, (B, 1, D), dtype=jnp.float32)   # (B, 1, D)
    y = jax.random.normal(ky, (1, N, D), dtype=jnp.float32)   # (1, N, D)
    out = jax.block_until_ready(similarity(x, y, temp))
    ref = _reference(x, y, temp)
    assert out.shape == (B, N)
    assert jnp.allclose(out, ref, atol=1e-4, rtol=1e-4)

    # Case 2: irregular sizes exercising the padding / slicing path.
    B2, N2, D2 = 10, 12, 40
    kx2, ky2 = jax.random.split(key)
    x2 = jax.random.normal(kx2, (B2, 1, D2), dtype=jnp.float32)
    y2 = jax.random.normal(ky2, (1, N2, D2), dtype=jnp.float32)
    out2 = jax.block_until_ready(similarity(x2, y2, temp))
    ref2 = _reference(x2, y2, temp)
    assert out2.shape == (B2, N2)
    assert jnp.allclose(out2, ref2, atol=1e-4, rtol=1e-4)

    print("KERNEL_OK")
</pallas_src>

<mosaic_0001>
module attributes {stable_mosaic.version = 11 : i64} {
  func.func @_sim_kernel(%arg0: i32, %arg1: i32, %arg2: memref<8x128xf32, #tpu.memory_space<vmem>>, %arg3: memref<128x128xf32, #tpu.memory_space<vmem>>, %arg4: memref<8x128xf32, #tpu.memory_space<vmem>>) attributes {dimension_semantics = [#tpu.dimension_semantics<parallel>, #tpu.dimension_semantics<parallel>], iteration_bounds = array<i64: 1, 1>, scalar_prefetch = 0 : i64, scratch_operands = 0 : i64, tpu.core_type = #tpu.core_type<tc>, window_params = [{transform_indices = @transform_0, window_bounds = array<i64: 8, 128>}, {transform_indices = @transform_1, window_bounds = array<i64: 128, 128>}, {transform_indices = @transform_2, window_bounds = array<i64: 8, 128>}]} {
    %c0 = arith.constant 0 : index
    %c0_0 = arith.constant 0 : index
    %0 = vector.load %arg2[%c0, %c0_0] : memref<8x128xf32, #tpu.memory_space<vmem>>, vector<8x128xf32>
    %c0_1 = arith.constant 0 : index
    %c0_2 = arith.constant 0 : index
    %1 = vector.load %arg3[%c0_1, %c0_2] : memref<128x128xf32, #tpu.memory_space<vmem>>, vector<128x128xf32>
    %2 = arith.mulf %0, %0 : vector<8x128xf32>
    %cst = arith.constant dense<0.000000e+00> : vector<8xf32>
    %3 = vector.multi_reduction <add>, %2, %cst [1] : vector<8x128xf32> to vector<8xf32>
    %4 = vector.shape_cast %3 : vector<8xf32> to vector<8x1xf32>
    %5 = math.sqrt %4 : vector<8x1xf32>
    %cst_3 = arith.constant 9.99999993E-9 : f32
    %6 = vector.broadcast %cst_3 : f32 to vector<8x1xf32>
    %7 = arith.maximumf %5, %6 : vector<8x1xf32>
    %cst_4 = arith.constant 2.000000e+01 : f32
    %8 = vector.broadcast %cst_4 : f32 to vector<8x1xf32>
    %9 = arith.divf %8, %7 : vector<8x1xf32>
    %10 = arith.mulf %1, %1 : vector<128x128xf32>
    %cst_5 = arith.constant dense<0.000000e+00> : vector<128xf32>
    %11 = vector.multi_reduction <add>, %10, %cst_5 [1] : vector<128x128xf32> to vector<128xf32>
    %12 = vector.shape_cast %11 : vector<128xf32> to vector<128x1xf32>
    %13 = math.sqrt %12 : vector<128x1xf32>
    %cst_6 = arith.constant 9.99999993E-9 : f32
    %14 = vector.broadcast %cst_6 : f32 to vector<128x1xf32>
    %15 = arith.maximumf %13, %14 : vector<128x1xf32>
    %cst_7 = arith.constant 1.000000e+00 : f32
    %16 = vector.broadcast %cst_7 : f32 to vector<128x1xf32>
    %17 = arith.divf %16, %15 : vector<128x1xf32>
    %18 = vector.broadcast %9 : vector<8x1xf32> to vector<8x128xf32>
    %19 = arith.mulf %0, %18 : vector<8x128xf32>
    %20 = vector.broadcast %17 : vector<128x1xf32> to vector<128x128xf32>
    %21 = arith.mulf %1, %20 : vector<128x128xf32>
    %cst_8 = arith.constant dense<0.000000e+00> : vector<8x128xf32>
    %22 = tpu.matmul %19, %21, %cst_8 {dimension_numbers = #tpu.dot_dimension_numbers<[1], [1], [0], [0], [0, 0, 1, 0], [], []>} : vector<8x128xf32>, vector<128x128xf32>, vector<8x128xf32> -> vector<8x128xf32>
    %c0_9 = arith.constant 0 : index
    %c0_10 = arith.constant 0 : index
    %23 = vector.load %arg4[%c0_9, %c0_10] : memref<8x128xf32, #tpu.memory_space<vmem>>, vector<8x128xf32>
    tpu.vector_store %arg4[%c0_9, %c0_10], %22 {strides = array<i32>} : memref<8x128xf32, #tpu.memory_space<vmem>>, vector<8x128xf32>,
    return
  }
  func.func @transform_0(%arg0: i32, %arg1: i32) -> (i32, i32) {
    %c0_i32 = arith.constant 0 : i32
    %c0_i32_0 = arith.constant 0 : i32
    return %arg0, %c0_i32 : i32, i32
  }
  func.func @transform_1(%arg0: i32, %arg1: i32) -> (i32, i32) {
    %c0_i32 = arith.constant 0 : i32
    %c0_i32_0 = arith.constant 0 : i32
    return %arg1, %c0_i32 : i32, i32
  }
  func.func @transform_2(%arg0: i32, %arg1: i32) -> (i32, i32) {
    %c0_i32 = arith.constant 0 : i32
    return %arg0, %arg1 : i32, i32
  }
}

</mosaic_0001>

<bundles_post_ra>
// kernel: tpu_custom_call.1
= control target key start
LH: loop header
LB: loop body
LE: loop exit
PB: predicated region body
PF: predicated region fallthrough
CT: control target
= control target key end

     0   :  { %7 = vsyncpa [#allocation3], 0  ;;  %s869_s0 = inlined_call_operand.hbm [shape: f32[8,128], index: 0, kind: input, shape index: {}]   ;;  %s870_s1 = inlined_call_operand.hbm [shape: f32[128,128], index: 1, kind: input, shape index: {}]   ;;  %s871_s2 = inlined_call_operand.hbm [shape: f32[8,128], index: 2, kind: output, shape index: {}]  }
   0x1   :  { %8 = vsyncpa [#allocation6], 0 }
   0x2   :  { %9 = vsyncpa [#allocation4], 0  ;;  %s604_s9 = smov [#allocation2]   ;;  %s605_s11 = smov [#allocation5]  }
   0x3   :  { %s16_s10 = sshll.u32 %s604_s9, 4  ;;  %s25_s12 = sshll.u32 %s605_s11, 4  ;;  %s17_s10 = int_to_ptr.vmem [resolvable:$true] %s16_s10  ;;  %s627_s12 = int_to_ptr.vmem [resolvable:$true] %s25_s12 }
   0x4   :  { %s532_s15 = scalar_lea.hbm %s869_s0, 128 }
   0x5   :  { %p533_p0 = scmp.ne.s32.totalorder %s869_s0, %s532_s15  ;;  %p536_p1 = scmp.lt.u32.totalorder %s532_s15, %s869_s0 }
   0x7   :  { %p538_p2 = pnand %p536_p1, %p533_p0 }
   0x9   :  { %541 = shalt.err (!%p538_p2)
}
   0xa   :  { %s542_s20 = scalar_lea.vmem %s17_s10, 128  ;;  %p547_p4 = scmp.lt.s32.totalorder %s17_s10, %s17_s10 }
   0xb   :  { %p543_p3 = scmp.ne.s32.totalorder %s17_s10, %s542_s20  ;;  %p548_p5 = scmp.lt.s32.totalorder %s542_s20, %s542_s20 }
   0xd   :  { %p549_p6 = por %p548_p5, %p547_p4 }
   0xf   :  { %p550_p7 = pnand %p549_p6, %p543_p3 }
  0x11   :  { %553 = shalt.err (!%p550_p7)
}
  0x12   :  { %19 = dma.hbm_to_vmem [thread:$0]  %s869_s0, 128, %s17_s10, [#allocation3]  }
  0x13   :  { %s554_s25 = scalar_lea.hbm %s870_s1, 2048 }
  0x14   :  { %p555_p8 = scmp.ne.s32.totalorder %s870_s1, %s554_s25  ;;  %p558_p9 = scmp.lt.u32.totalorder %s554_s25, %s870_s1 }
  0x16   :  { %p560_p10 = pnand %p558_p9, %p555_p8 }
  0x18   :  { %563 = shalt.err (!%p560_p10)
}
  0x19   :  { %s564_s30 = scalar_lea.vmem %s627_s12, 2048  ;;  %p569_p12 = scmp.lt.s32.totalorder %s627_s12, %s627_s12 }
  0x1a   :  { %p565_p11 = scmp.ne.s32.totalorder %s627_s12, %s564_s30  ;;  %p570_p13 = scmp.lt.s32.totalorder %s564_s30, %s564_s30 }
  0x1c   :  { %p571_p0 = por %p570_p13, %p569_p12 }
  0x1e   :  { %p572_p1 = pnand %p571_p0, %p565_p11 }
  0x20   :  { %575 = shalt.err (!%p572_p1)
}
  0x21   :  { %s606_s0 = smov 128   ;;  %s607_s3 = smov 8  }
  0x22   :  { %31 = dma.hbm_to_vmem [thread:$0]  %s870_s1, 2048, %s627_s12, [#allocation6], %s606_s0, %s606_s0, %s607_s3  }
  0x23   :  { %598 = dma.done.wait [#allocation3], 128  }
  0x24   :  { %599 = vsyncadd [#allocation3], 4294967168 }
  0x25   :  { %600 = dma.done.wait [#allocation6], 2048  }
  0x26   :  { %601 = vsyncadd [#allocation6], 4294965248  ;;  %v658_v0 = vld [vmem:[#allocation5 + $0x10] sm:$0xff]  ;;  %v660_v1 = vld [vmem:[#allocation5] sm:$0xff]  ;;  %v608_v34 = vmov 0.0|0.0   ;;  %vm609_vm0 = vmmov 0  }
  0x27   :  { %v662_v2 = vld [vmem:[#allocation5 + $0x18] sm:$0xff]  ;;  %v70_v3 = vmul.f32 %v658_v0, %v658_v0  ;;  %v68_v4 = vmul.f32 %v660_v1, %v660_v1  ;;  %v668_v5 = vld [vmem:[#allocation5 + $0x8] sm:$0xff]  ;;  %v676_v9 = vld [vmem:[#allocation5 + $0x20] sm:$0xff]  ;;  %432 = vmatprep.subr.bf16.mxu0 %v608_v34  ;;  %v610_v35 = vmov 0.0   ;;  %s611_s1 = smov [#allocation7]  }
  0x28   :  { %v71_v6 = vmul.f32 %v662_v2, %v662_v2  ;;  %v69_v7 = vmul.f32 %v668_v5, %v668_v5  ;;  %v674_v8 = vld [vmem:[#allocation5 + $0x28] sm:$0xff]  ;;  %v72_v11 = vmul.f32 %v676_v9, %v676_v9  ;;  %v682_v12 = vld [vmem:[#allocation5 + $0x38] sm:$0xff]  ;;  %v684_v13 = vld [vmem:[#allocation5 + $0x30] sm:$0xff]  ;;  %429 = vmatprep.mubr.msk.f32.mxu0 %vm609_vm0, %v610_v35  ;;  %s370_s6 = sshll.u32 %s611_s1, 4  ;;  %s371_s6 = int_to_ptr.vmem [resolvable:$true] %s370_s6 }
  0x29   :  { %88 = vadd.xlane.f32.xlu1 %v70_v3  ;;  %84 = vadd.xlane.f32.xlu0 %v68_v4  ;;  %v73_v10 = vmul.f32 %v674_v8, %v674_v8  ;;  %v75_v14 = vmul.f32 %v682_v12, %v682_v12  ;;  %v74_v15 = vmul.f32 %v684_v13, %v684_v13  ;;  %v690_v16 = vld [vmem:[#allocation5 + $0x48] sm:$0xff]  ;;  %v692_v17 = vld [vmem:[#allocation5 + $0x40] sm:$0xff]  ;;  %v698_v20 = vld [vmem:[#allocation5 + $0x58] sm:$0xff]  ;;  %s576_s7 = scalar_lea.vmem %s371_s6, 128  ;;  %p581_p3 = scmp.lt.s32.totalorder %s371_s6, %s371_s6 }
  0x2a   :  { %v77_v18 = vmul.f32 %v690_v16, %v690_v16  ;;  %v76_v19 = vmul.f32 %v692_v17, %v692_v17  ;;  %v700_v21 = vld [vmem:[#allocation5 + $0x50] sm:$0xff]  ;;  %v79_v22 = vmul.f32 %v698_v20, %v698_v20  ;;  %v706_v24 = vld [vmem:[#allocation5 + $0x68] sm:$0xff]  ;;  %v708_v25 = vld [vmem:[#allocation5 + $0x60] sm:$0xff]  ;;  %p577_p2 = scmp.ne.s32.totalorder %s371_s6, %s576_s7  ;;  %p582_p4 = scmp.lt.s32.totalorder %s576_s7, %s576_s7 }
  0x2b   :  { %v78_v23 = vmul.f32 %v700_v21, %v700_v21  ;;  %v81_v26 = vmul.f32 %v706_v24, %v706_v24  ;;  %v80_v27 = vmul.f32 %v708_v25, %v708_v25  ;;  %v714_v28 = vld [vmem:[#allocation5 + $0x78] sm:$0xff]  ;;  %v716_v29 = vld [vmem:[#allocation5 + $0x70] sm:$0xff] }
  0x2c   :  { %v83_v30 = vmul.f32 %v714_v28, %v714_v28  ;;  %v82_v31 = vmul.f32 %v716_v29, %v716_v29  ;;  %v722_v32 = vld [vmem:[#allocation2] sm:$0xff]  ;;  %p583_p5 = por %p582_p4, %p581_p3 }
  0x2d   :  { %90 = vadd.xlane.f32.xlu1 %v71_v6  ;;  %86 = vadd.xlane.f32.xlu0 %v69_v7  ;;  %v55_v33 = vmul.f32 %v722_v32, %v722_v32 }
  0x2e   :  { %p584_p6 = pnand %p583_p5, %p577_p2 }
  0x31   :  { %94 = vadd.xlane.f32.xlu1 %v73_v10  ;;  %92 = vadd.xlane.f32.xlu0 %v72_v11 }
  0x35   :  { %98 = vadd.xlane.f32.xlu1 %v75_v14  ;;  %96 = vadd.xlane.f32.xlu0 %v74_v15 }
  0x39   :  { %102 = vadd.xlane.f32.xlu1 %v77_v18  ;;  %100 = vadd.xlane.f32.xlu0 %v76_v19 }
  0x3d   :  { %106 = vadd.xlane.f32.xlu1 %v79_v22  ;;  %104 = vadd.xlane.f32.xlu0 %v78_v23 }
  0x41   :  { %110 = vadd.xlane.f32.xlu1 %v81_v26  ;;  %108 = vadd.xlane.f32.xlu0 %v80_v27 }
  0x45   :  { %114 = vadd.xlane.f32.xlu1 %v83_v30  ;;  %112 = vadd.xlane.f32.xlu0 %v82_v31 }
  0x49   :  { %56 = vadd.xlane.f32.xlu0 %v55_v33 }
  0xb6   :  { %v89_v36 = vpop.xlane.xlu1 %88  ;;  %v85_v37 = vpop.xlane.xlu0 %84 }
  0xb7   :  { %464 = vrsqrt.f32 %v85_v37  ;;  %vm118_vm1 = vcmp.eq.f32.partialorder %v85_v37, inf  ;;  %v121_v50 = vand.u32 2147483648, %v85_v37  ;;  %vm120_vm3 = vcmp.eq.f32.partialorder %v85_v37, 0.0 }
  0xb8   :  { %vm132_vm6 = vcmp.eq.f32.partialorder %v89_v36, inf  ;;  %v135_v6 = vand.u32 2147483648, %v89_v36  ;;  %vm134_vm8 = vcmp.eq.f32.partialorder %v89_v36, 0.0 }
  0xba   :  { %v91_v38 = vpop.xlane.xlu1 %90  ;;  %v87_v39 = vpop.xlane.xlu0 %86 }
  0xbb   :  { %466 = vrsqrt.f32 %v91_v38  ;;  %vm125_vm2 = vcmp.eq.f32.partialorder %v87_v39, inf  ;;  %v128_v54 = vand.u32 2147483648, %v87_v39  ;;  %vm127_vm4 = vcmp.eq.f32.partialorder %v87_v39, 0.0 }
  0xbc   :  { %468 = vrsqrt.f32 %v87_v39  ;;  %vm139_vm5 = vcmp.eq.f32.partialorder %v91_v38, inf  ;;  %v142_v62 = vand.u32 2147483648, %v91_v38  ;;  %vm141_vm7 = vcmp.eq.f32.partialorder %v91_v38, 0.0 }
  0xbd   :  { %470 = vrsqrt.f32 %v89_v36 }
  0xbe   :  { %v727_v40 = vpop.xlane.xlu1 %94  ;;  %v729_v41 = vpop.xlane.xlu0 %92 }
  0xbf   :  { %472 = vrsqrt.f32 %v727_v40  ;;  %vm153_vm9 = vcmp.eq.f32.partialorder %v727_v40, inf  ;;  %vm146_vm10 = vcmp.eq.f32.partialorder %v729_v41, inf  ;;  %v156_v19 = vand.u32 2147483648, %v727_v40 }
  0xc0   :  { %474 = vrsqrt.f32 %v729_v41  ;;  %vm155_vm11 = vcmp.eq.f32.partialorder %v727_v40, 0.0  ;;  %v149_v23 = vand.u32 2147483648, %v729_v41  ;;  %vm148_vm12 = vcmp.eq.f32.partialorder %v729_v41, 0.0 }
  0xc1   :  { %v465_v42 = vpop.eup %464 }
  0xc2   :  { %v117_v43 = vmul.f32 %v465_v42, %v85_v37  ;;  %v733_v49 = vpop.xlane.xlu1 %98  ;;  %v735_v53 = vpop.xlane.xlu0 %96 }
  0xc3   :  { %476 = vrsqrt.f32 %v733_v49  ;;  %vm167_vm13 = vcmp.eq.f32.partialorder %v733_v49, inf  ;;  %vm160_vm14 = vcmp.eq.f32.partialorder %v735_v53, inf  ;;  %vm169_vm15 = vcmp.eq.f32.partialorder %v733_v49, 0.0 }
  0xc4   :  { %v119_v48 = vsel %vm118_vm1, %v85_v37, %v117_v43  ;;  %478 = vrsqrt.f32 %v735_v53  ;;  %v170_v43 = vand.u32 2147483648, %v733_v49  ;;  %vm162_vm0 = vcmp.eq.f32.partialorder %v735_v53, 0.0 }
  0xc5   :  { %v467_v44 = vpop.eup %466  ;;  %v122_v56 = vsel %vm120_vm3, %v121_v50, %v119_v48 }
  0xc6   :  { %v469_v45 = vpop.eup %468  ;;  %v138_v51 = vmul.f32 %v467_v44, %v91_v38  ;;  %v228_v61 = vmax.f32 %v122_v56, 1e-08  ;;  %v739_v63 = vpop.xlane.xlu1 %102 }
  0xc7   :  { %v124_v46 = vmul.f32 %v469_v45, %v87_v39  ;;  %v471_v47 = vpop.eup %470  ;;  %480 = vrsqrt.f32 %v739_v63  ;;  %v745_v14 = vpop.xlane.xlu0 %100  ;;  %vm181_vm1 = vcmp.eq.f32.partialorder %v739_v63, inf  ;;  %vm183_vm3 = vcmp.eq.f32.partialorder %v739_v63, 0.0 }
  0xc8   :  { %v131_v55 = vmul.f32 %v471_v47, %v89_v36  ;;  %v140_v59 = vsel %vm139_vm5, %v91_v38, %v138_v51  ;;  %482 = vrcp.f32 %v228_v61  ;;  %v184_v61 = vand.u32 2147483648, %v739_v63 }
  0xc9   :  { %v126_v52 = vsel %vm125_vm2, %v87_v39, %v124_v46  ;;  %v473_v58 = vpop.eup %472  ;;  %v143_v7 = vsel %vm141_vm7, %v142_v62, %v140_v59  ;;  %v163_v46 = vand.u32 2147483648, %v735_v53  ;;  %vm174_vm2 = vcmp.eq.f32.partialorder %v745_v14, inf }
  0xca   :  { %v129_v57 = vsel %vm127_vm4, %v128_v54, %v126_v52  ;;  %v475_v60 = vpop.eup %474  ;;  %v133_v3 = vsel %vm132_vm6, %v89_v36, %v131_v55  ;;  %v152_v10 = vmul.f32 %v473_v58, %v727_v40  ;;  %v231_v18 = vmax.f32 %v143_v7, 1e-08  ;;  %v756_v37 = vpop.xlane.xlu1 %106 }
  0xcb   :  { %v229_v4 = vmax.f32 %v129_v57, 1e-08  ;;  %v145_v11 = vmul.f32 %v475_v60, %v729_v41  ;;  %v136_v15 = vsel %vm134_vm8, %v135_v6, %v133_v3  ;;  %v760_v39 = vpop.xlane.xlu0 %104  ;;  %v177_v3 = vand.u32 2147483648, %v745_v14 }
  0xcc   :  { %v154_v22 = vsel %vm153_vm9, %v727_v40, %v152_v10  ;;  %v230_v27 = vmax.f32 %v136_v15, 1e-08  ;;  %vm176_vm4 = vcmp.eq.f32.partialorder %v745_v14, 0.0  ;;  %vm195_vm5 = vcmp.eq.f32.partialorder %v756_v37, inf }
  0xcd   :  { %484 = vrcp.f32 %v229_v4  ;;  %v477_v26 = vpop.eup %476  ;;  %v147_v30 = vsel %vm146_vm10, %v729_v41, %v145_v11  ;;  %v157_v33 = vsel %vm155_vm11, %v156_v19, %v154_v22  ;;  %vm197_vm6 = vcmp.eq.f32.partialorder %v756_v37, 0.0 }
  0xce   :  { %486 = vrsqrt.f32 %v745_v14  ;;  %v479_v31 = vpop.eup %478  ;;  %v150_v35 = vsel %vm148_vm12, %v149_v23, %v147_v30  ;;  %v166_v36 = vmul.f32 %v477_v26, %v733_v49  ;;  %v233_v40 = vmax.f32 %v157_v33, 1e-08  ;;  %v774_v57 = vpop.xlane.xlu1 %110 }
  0xcf   :  { %488 = vrcp.f32 %v231_v18  ;;  %v159_v38 = vmul.f32 %v479_v31, %v735_v53  ;;  %v232_v41 = vmax.f32 %v150_v35, 1e-08  ;;  %vm188_vm7 = vcmp.eq.f32.partialorder %v760_v39, inf }
  0xd0   :  { %490 = vrcp.f32 %v230_v27  ;;  %v168_v45 = vsel %vm167_vm13, %v733_v49, %v166_v36  ;;  %v198_v30 = vand.u32 2147483648, %v756_v37  ;;  %v191_v31 = vand.u32 2147483648, %v760_v39 }
  0xd1   :  { %v481_v42 = vpop.eup %480  ;;  %492 = vrsqrt.f32 %v756_v37  ;;  %v161_v48 = vsel %vm160_vm14, %v735_v53, %v159_v38  ;;  %v171_v54 = vsel %vm169_vm15, %v170_v43, %v168_v45  ;;  %v778_v53 = vpop.xlane.xlu0 %108  ;;  %vm190_vm8 = vcmp.eq.f32.partialorder %v760_v39, 0.0 }
  0xd2   :  { %v483_v44 = vpop.eup %482  ;;  %494 = vrsqrt.f32 %v760_v39  ;;  %v164_v55 = vsel %vm162_vm0, %v163_v46, %v161_v48  ;;  %v180_v49 = vmul.f32 %v481_v42, %v739_v63  ;;  %v235_v60 = vmax.f32 %v171_v54, 1e-08  ;;  %v793_v23 = vpop.xlane.xlu1 %114 }
  0xd3   :  { %496 = vrcp.f32 %v233_v40  ;;  %v277_v51 = vmul.f32 %v483_v44, %v660_v1  ;;  %vm209_vm9 = vcmp.eq.f32.partialorder %v774_v57, inf  ;;  %vm202_vm10 = vcmp.eq.f32.partialorder %v778_v53, inf }
  0xd4   :  { %498 = vrcp.f32 %v232_v41  ;;  %v182_v62 = vsel %vm181_vm1, %v739_v63, %v180_v49  ;;  %vm211_vm11 = vcmp.eq.f32.partialorder %v774_v57, 0.0  ;;  %vm204_vm12 = vcmp.eq.f32.partialorder %v778_v53, 0.0 }
  0xd5   :  { %500 = vrsqrt.f32 %v774_v57  ;;  %v185_v15 = vsel %vm183_vm3, %v184_v61, %v182_v62  ;;  %v797_v27 = vpop.xlane.xlu0 %112  ;;  %vm223_vm13 = vcmp.eq.f32.partialorder %v793_v23, inf  ;;  %vm225_vm15 = vcmp.eq.f32.partialorder %v793_v23, 0.0 }
  0xd6   :  { %502 = vrsqrt.f32 %v778_v53  ;;  %vm216_vm14 = vcmp.eq.f32.partialorder %v797_v27, inf  ;;  %vm218_vm0 = vcmp.eq.f32.partialorder %v797_v27, 0.0 }
  0xd7   :  { %v485_v47 = vpop.eup %484  ;;  %504 = vrcp.f32 %v235_v60 }
  0xd8   :  { %v487_v50 = vpop.eup %486  ;;  %v278_v52 = vmul.f32 %v485_v47, %v668_v5  ;;  %v234_v5 = vmax.f32 %v164_v55, 1e-08 }
  0xd9   :  { %v489_v58 = vpop.eup %488  ;;  %v173_v59 = vmul.f32 %v487_v50, %v745_v14  ;;  %v814_v47 = vpop.xlane.xlu0 %56 }
  0xda   :  { %v433_v56 = vpack.c.bf16 %v278_v52, %v277_v51  ;;  %v491_v1 = vpop.eup %490  ;;  %v280_v4 = vmul.f32 %v489_v58, %v662_v2  ;;  %506 = vrcp.f32 %v234_v5  ;;  %v205_v51 = vand.u32 2147483648, %v778_v53 }
  0xdb   :  { %v493_v6 = vpop.eup %492  ;;  %v175_v7 = vsel %vm174_vm2, %v745_v14, %v173_v59  ;;  %v279_v11 = vmul.f32 %v491_v1, %v658_v0  ;;  %v237_v14 = vmax.f32 %v185_v15, 1e-08  ;;  %508 = vrsqrt.f32 %v793_v23 }
  0xdc   :  { %434 = vmatpush3.bf16.xpose.msra.mxu0 %v433_v56  ;;  %v495_v10 = vpop.eup %494  ;;  %v178_v19 = vsel %vm176_vm4, %v177_v3, %v175_v7  ;;  %v194_v63 = vmul.f32 %v493_v6, %v756_v37  ;;  %510 = vrsqrt.f32 %v797_v27  ;;  %v219_v3 = vand.u32 2147483648, %v797_v27 }
  0xdd   :  { %435 = vmatprep.subr.bf16.mxu0 %v608_v34  ;;  %v497_v18 = vpop.eup %496  ;;  %v436_v22 = vpack.c.bf16 %v280_v4, %v279_v11  ;;  %v187_v2 = vmul.f32 %v495_v10, %v760_v39  ;;  %v236_v0 = vmax.f32 %v178_v19, 1e-08  ;;  %512 = vrcp.f32 %v237_v14 }
  0xde   :  { %v499_v26 = vpop.eup %498  ;;  %v196_v33 = vsel %vm195_vm5, %v756_v37, %v194_v63  ;;  %v282_v36 = vmul.f32 %v497_v18, %v674_v8  ;;  %v212_v37 = vand.u32 2147483648, %v774_v57  ;;  %vm60_vm1 = vcmp.eq.f32.partialorder %v814_v47, inf }
  0xdf   :  { %v281_v35 = vmul.f32 %v499_v26, %v676_v9  ;;  %v501_v38 = vpop.eup %500  ;;  %v189_v40 = vsel %vm188_vm7, %v760_v39, %v187_v2  ;;  %514 = vrcp.f32 %v236_v0  ;;  %v199_v41 = vsel %vm197_vm6, %v198_v30, %v196_v33 }
  0xe0   :  { %v503_v42 = vpop.eup %502  ;;  %v192_v44 = vsel %vm190_vm8, %v191_v31, %v189_v40  ;;  %v208_v45 = vmul.f32 %v501_v38, %v774_v57  ;;  %v239_v48 = vmax.f32 %v199_v41, 1e-08  ;;  %516 = vrsqrt.f32 %v814_v47 }
  0xe1   :  { %v505_v43 = vpop.eup %504  ;;  %v439_v46 = vpack.c.bf16 %v282_v36, %v281_v35  ;;  %v201_v8 = vmul.f32 %v503_v42, %v778_v53  ;;  %v238_v39 = vmax.f32 %v192_v44, 1e-08  ;;  %vm62_vm2 = vcmp.eq.f32.partialorder %v814_v47, 0.0 }
  0xe2   :  { %v210_v50 = vsel %vm209_vm9, %v774_v57, %v208_v45  ;;  %v284_v54 = vmul.f32 %v505_v43, %v682_v12  ;;  %518 = vrcp.f32 %v239_v48 }
  0xe3   :  { %v203_v49 = vsel %vm202_vm10, %v778_v53, %v201_v8  ;;  %520 = vrcp.f32 %v238_v39  ;;  %v213_v58 = vsel %vm211_vm11, %v212_v37, %v210_v50  ;;  %v226_v53 = vand.u32 2147483648, %v793_v23 }
  0xe4   :  { %437 = vmatpush3.bf16.xpose.msra.mxu0 %v436_v22  ;;  %v507_v9 = vpop.eup %506  ;;  %v206_v60 = vsel %vm204_vm12, %v205_v51, %v203_v49  ;;  %v241_v12 = vmax.f32 %v213_v58, 1e-08 }
  0xe5   :  { %438 = vmatprep.subr.bf16.mxu0 %v608_v34  ;;  %v283_v52 = vmul.f32 %v507_v9, %v684_v13  ;;  %v509_v55 = vpop.eup %508  ;;  %v240_v61 = vmax.f32 %v206_v60, 1e-08 }
  0xe6   :  { %v511_v56 = vpop.eup %510  ;;  %v222_v1 = vmul.f32 %v509_v55, %v793_v23  ;;  %522 = vrcp.f32 %v241_v12 }
  0xe7   :  { %v513_v59 = vpop.eup %512  ;;  %v442_v57 = vpack.c.bf16 %v284_v54, %v283_v52  ;;  %v215_v13 = vmul.f32 %v511_v56, %v797_v27  ;;  %524 = vrcp.f32 %v240_v61 }
  0xe8   :  { %v224_v62 = vsel %vm223_vm13, %v793_v23, %v222_v1  ;;  %v286_v6 = vmul.f32 %v513_v59, %v690_v16  ;;  %v63_v16 = vand.u32 2147483648, %v814_v47 }
  0xe9   :  { %v515_v5 = vpop.eup %514  ;;  %v217_v10 = vsel %vm216_vm14, %v797_v27, %v215_v13  ;;  %v227_v11 = vsel %vm225_vm15, %v226_v53, %v224_v62 }
  0xea   :  { %v285_v4 = vmul.f32 %v515_v5, %v692_v17  ;;  %v517_v7 = vpop.eup %516  ;;  %v220_v18 = vsel %vm218_vm0, %v219_v3, %v217_v10  ;;  %v243_v23 = vmax.f32 %v227_v11, 1e-08 }
  0xeb   :  { %v59_v19 = vmul.f32 %v517_v7, %v814_v47  ;;  %v242_v17 = vmax.f32 %v220_v18, 1e-08 }
  0xec   :  { %440 = vmatpush3.bf16.xpose.msra.mxu0 %v439_v46  ;;  %v519_v15 = vpop.eup %518  ;;  %v445_v63 = vpack.c.bf16 %v286_v6, %v285_v4  ;;  %526 = vrcp.f32 %v243_v23 }
  0xed   :  { %441 = vmatprep.subr.bf16.mxu0 %v608_v34  ;;  %v521_v22 = vpop.eup %520  ;;  %v61_v26 = vsel %vm60_vm1, %v814_v47, %v59_v19  ;;  %v288_v27 = vmul.f32 %v519_v15, %v698_v20  ;;  %528 = vrcp.f32 %v242_v17 }
  0xee   :  { %v287_v2 = vmul.f32 %v521_v22, %v700_v21  ;;  %v64_v14 = vsel %vm62_vm2, %v63_v16, %v61_v26 }
  0xef   :  { %v65_v33 = vmax.f32 %v64_v14, 1e-08 }
  0xf0   :  { %v523_v0 = vpop.eup %522  ;;  %v448_v30 = vpack.c.bf16 %v288_v27, %v287_v2 }
  0xf1   :  { %v525_v31 = vpop.eup %524  ;;  %v290_v36 = vmul.f32 %v523_v0, %v706_v24  ;;  %530 = vrcp.f32 %v65_v33 }
  0xf2   :  { %v289_v35 = vmul.f32 %v525_v31, %v708_v25 }
  0xf4   :  { %443 = vmatpush3.bf16.xpose.msra.mxu0 %v442_v57  ;;  %v451_v40 = vpack.c.bf16 %v290_v36, %v289_v35 }
  0xf5   :  { %444 = vmatprep.subr.bf16.mxu0 %v608_v34 }
  0xf6   :  { %v527_v38 = vpop.eup %526 }
  0xf7   :  { %v529_v21 = vpop.eup %528  ;;  %v292_v42 = vmul.f32 %v527_v38, %v714_v28 }
  0xf8   :  { %v291_v20 = vmul.f32 %v529_v21, %v716_v29 }
  0xfa   :  { %v454_v43 = vpack.c.bf16 %v292_v42, %v291_v20 }
  0xfb   :  { %v531_v41 = vpop.eup %530 }
  0xfc   :  { %446 = vmatpush3.bf16.xpose.msra.mxu0 %v445_v63  ;;  %v67_v44 = vmul.f32 20.0, %v531_v41 }
  0xfd   :  { %447 = vmatprep.subr.bf16.mxu0 %v608_v34 }
  0xfe   :  { %v276_v45 = vmul.f32 %v67_v44, %v722_v32 }
 0x104   :  { %449 = vmatpush3.bf16.xpose.msra.mxu0 %v448_v30 }
 0x105   :  { %450 = vmatprep.subr.bf16.mxu0 %v608_v34 }
 0x10c   :  { %452 = vmatpush3.bf16.xpose.msra.mxu0 %v451_v40 }
 0x10d   :  { %453 = vmatprep.subr.bf16.mxu0 %v608_v34 }
 0x114   :  { %455 = vmatpush3.bf16.xpose.msra.mxu0 %v454_v43 }
 0x11b   :  { %430 = vmatmul.mubr.f32.vlgmr.msra.gmra.mrb[0].mxu0 %v276_v45 }
 0x1ee   :  { %v359_v24 = vpop.f32.mrb[0].mxu0 }
 0x1ef   :  { %363 = vst [vmem:[#allocation7] sm:$0xff] %v359_v24  ;;  %v431_v25 = vpop.f32.mrb[1].mxu0 }
 0x1f0   :  { %587 = shalt.err (!%p584_p6)
}
 0x1f1   :  { %s588_s10 = scalar_lea.hbm %s871_s2, 128 }
 0x1f2   :  { %p589_p7 = scmp.ne.s32.totalorder %s871_s2, %s588_s10  ;;  %p592_p8 = scmp.lt.u32.totalorder %s588_s10, %s871_s2 }
 0x1f4   :  { %p594_p9 = pnand %p592_p8, %p589_p7 }
 0x1f6   :  { %597 = shalt.err (!%p594_p9)
}
 0x1f7   :  { %373 = dma.vmem_to_hbm [thread:$0]  %s371_s6, 128, %s871_s2, [#allocation4]  }
 0x1f8   :  { %602 = dma.done.wait [#allocation4], 128  }
 0x1f9   :  { %603 = vsyncadd [#allocation4], 4294967168 }
 0x1fa   :  { %377 = vsyncpa [#allocation3], 1 }
 0x1fb   :  { %378 = vsyncpa [#allocation6], 1 }
 0x1fc   :  { %379 = vsyncpa [#allocation4], 1 }

</bundles_post_ra>
